<compile_context>
chip_gen: v7x
topology: tpu7x:2x2x1
jax: 0.10.0
libtpu: 0.0.40
codegen_flags: <defaults>
</compile_context>

<pallas_src>
import functools

import jax
import jax.numpy as jnp
from jax.experimental import pallas as pl
from jax.experimental.pallas import tpu as pltpu

_LANE = 128
_SUBLANE = 8
# Effectively -inf under softmax without inf-inf NaN risk.  Must stay float32: cast to
# bf16 it would round to -inf and an all-padded row would produce NaNs.
_NEG_BIG = -1e30


def _round_up(n, m):
    return (n + m - 1) // m * m


def _class_pad_multiple(hidden, num_classes):
    # v6e/v7x MXUs are 256 wide; only pad that far when the matmul actually matters.
    return 256 if (hidden >= 512 and num_classes >= 512) else _LANE


def _vmem_budget_and_limit():
    """Generation-aware VMEM budget (tile sizing) and scoped limit (Mosaic)."""
    cap = None
    try:
        cap = getattr(pltpu.get_tpu_info(), "vmem_capacity_bytes", None)
    except Exception:
        cap = None
    if cap is None:
        cap = 64 * 1024 * 1024                       # conservative (v7x-sized) fallback
    if cap >= 96 * 1024 * 1024:                      # v5e / v6e: 128 MiB physical
        return 100 * 1024 * 1024, 112 * 1024 * 1024
    return 40 * 1024 * 1024, 48 * 1024 * 1024        # v7x: 64 MiB physical


def _softmax_model_kernel(x_ref, w_ref, b_ref, o_ref, *, compute_dtype,
                          approx_reciprocal):
    # x arrives in its native dtype; cast to the MXU operand dtype in-VMEM
    # (no standalone HBM astype round trip in the wrapper).
    x = x_ref[...].astype(compute_dtype)
    # 1/temperature is already folded into w and b by prepare_softmax_model_params();
    # padded class columns carry a large-negative f32 bias so exp() makes them zero.
    logits = jnp.dot(x, w_ref[...], preferred_element_type=jnp.float32)
    logits = logits + b_ref[...]                      # (tb, Cp) + (1, Cp), f32
    m = jnp.max(logits, axis=-1, keepdims=True)       # numerically-stable softmax
    e = jnp.exp(logits - m)
    denom = jnp.sum(e, axis=-1, keepdims=True)
    inv = pl.reciprocal(denom, approx=approx_reciprocal)   # EUP slot when approx
    o_ref[...] = (e * inv).astype(o_ref.dtype)


def prepare_softmax_model_params(w, b, temperature, *, compute_dtype=jnp.bfloat16):
    """One-time (init-time) transform of the Linear head.

    Folds 1/temperature into the params and pads the class axis to a lane/MXU-friendly
    width.  Call once and reuse the result for every forward (keeps the H x Cp HBM write
    out of the per-call path).
    """
    H, C = w.shape
    inv_t = 1.0 / jnp.asarray(temperature, jnp.float32)   # also works for traced temperature
    Cp = _round_up(C, _class_pad_multiple(H, C))
    w_p = jnp.zeros((H, Cp), compute_dtype)
    w_p = w_p.at[:, :C].set((w.astype(jnp.float32) * inv_t).astype(compute_dtype))
    # Bias stays float32 (see _NEG_BIG note); pad columns get the huge negative bias.
    b_p = jnp.full((1, Cp), _NEG_BIG, jnp.float32)
    b_p = b_p.at[:, :C].set(b.reshape(1, C).astype(jnp.float32) * inv_t)
    return w_p, b_p, C


def softmax_model_apply(x, w_p, b_p, num_classes, *, out_dtype=None,
                        approx_reciprocal=True):
    """y = softmax((x @ w + b) / temperature, axis=-1) using prepared params."""
    B, H = x.shape
    H2, Cp = w_p.shape
    assert H == H2
    compute_dtype = w_p.dtype
    out_dtype = x.dtype if out_dtype is None else out_dtype

    vmem_budget, vmem_limit = _vmem_budget_and_limit()

    x_bytes = x.dtype.itemsize
    c_bytes = jnp.dtype(compute_dtype).itemsize
    o_bytes = jnp.dtype(out_dtype).itemsize
    # Resident weight/bias: Pallas still allocates 2 buffers per input spec -> count 2x.
    fixed = 2 * (H * Cp * c_bytes + Cp * 4)
    # Per batch row: double-buffered x & out tiles, the in-kernel cast copy of x, and
    # ~3 f32 (tb, Cp) temporaries (logits, exp, normalized output).
    per_row = 2 * (H * x_bytes + Cp * o_bytes) + H * c_bytes + 3 * Cp * 4
    tb = max(vmem_budget - fixed, per_row) // per_row // _SUBLANE * _SUBLANE
    tb = max(_SUBLANE, min(int(tb), 1024))
    # Guarantee >= 2 grid steps when the batch allows it so v7x's second TC gets work.
    tb = min(tb, _round_up(-(-B // 2), _SUBLANE))

    # Ragged last block is fine: rows are independent and OOB output stores are masked.
    grid = (pl.cdiv(B, tb),)

    kernel = functools.partial(_softmax_model_kernel,
                               compute_dtype=compute_dtype,
                               approx_reciprocal=approx_reciprocal)

    cost = pl.CostEstimate(
        flops=2 * B * H * Cp,
        transcendentals=B * Cp,
        bytes_accessed=B * H * x_bytes + H * Cp * c_bytes + Cp * 4 + B * Cp * o_bytes)

    out = pl.pallas_call(
        kernel,
        out_shape=jax.ShapeDtypeStruct((B, Cp), out_dtype),
        grid_spec=pltpu.PrefetchScalarGridSpec(
            num_scalar_prefetch=0,
            grid=grid,
            in_specs=[
                pl.BlockSpec((tb, H), lambda i: (i, 0)),   # streamed activations
                pl.BlockSpec((H, Cp), lambda i: (0, 0)),   # resident weight
                pl.BlockSpec((1, Cp), lambda i: (0, 0)),   # resident bias (f32)
            ],
            out_specs=pl.BlockSpec((tb, Cp), lambda i: (i, 0)),
        ),
        compiler_params=pltpu.CompilerParams(
            dimension_semantics=("parallel",),             # megacore sharding on v7x
            vmem_limit_bytes=vmem_limit,
        ),
        cost_estimate=cost,
    )(x, w_p, b_p)

    return out[:, :num_classes]


def softmax_model(x, w, b, temperature, *, compute_dtype=jnp.bfloat16,
                  out_dtype=None, approx_reciprocal=True):
    """One-shot convenience wrapper.  Prefer prepare_... + ..._apply so the param
    transform is hoisted out of the per-forward path."""
    w_p, b_p, C = prepare_softmax_model_params(w, b, temperature,
                                               compute_dtype=compute_dtype)
    return softmax_model_apply(x, w_p, b_p, C, out_dtype=out_dtype,
                               approx_reciprocal=approx_reciprocal)


def reference(x, w, b, temperature):
    logits = x.astype(jnp.float32) @ w.astype(jnp.float32) + b.astype(jnp.float32)
    return jax.nn.softmax(logits / temperature, axis=-1).astype(x.dtype)


if __name__ == "__main__":
    # Small shapes consistent with the forward: x (batch, hidden) -> y (batch, classes)
    batch, hidden, num_classes = 8, 32, 16
    temperature = 2.0

    key = jax.random.PRNGKey(0)
    kx, kw, kb = jax.random.split(key, 3)
    x = jax.random.normal(kx, (batch, hidden), dtype=jnp.float32)
    # Deterministic "base_model" Linear parameters (synthetic init, no checkpoint).
    w = jax.random.normal(kw, (hidden, num_classes), dtype=jnp.float32) * 0.1
    b = jax.random.normal(kb, (1, num_classes), dtype=jnp.float32) * 0.1

    y_ref = reference(x, w, b, temperature)

    # Exact path (f32 MXU operands, exact reciprocal) -> tight tolerance.
    w_e, b_e, C = prepare_softmax_model_params(w, b, temperature,
                                               compute_dtype=jnp.float32)
    y_exact = jax.block_until_ready(
        softmax_model_apply(x, w_e, b_e, C, approx_reciprocal=False))
    assert y_exact.shape == (batch, num_classes)
    assert jnp.allclose(y_exact, y_ref, atol=1e-5, rtol=1e-5)
    assert jnp.allclose(jnp.sum(y_exact, axis=-1), jnp.ones((batch,)), atol=1e-5)

    # Optimized path (bf16 MXU operands, EUP approx reciprocal) -> looser tolerance.
    # Params are prepared once (init-time) and reused for every forward call.
    w_f, b_f, C = prepare_softmax_model_params(w, b, temperature,
                                               compute_dtype=jnp.bfloat16)
    y_fast = jax.block_until_ready(softmax_model_apply(x, w_f, b_f, C))
    assert y_fast.shape == (batch, num_classes)
    assert jnp.allclose(y_fast, y_ref, atol=2e-2, rtol=2e-2)
    assert jnp.allclose(jnp.sum(y_fast, axis=-1), jnp.ones((batch,)), atol=2e-2)

    print("KERNEL_OK")
</pallas_src>

<mosaic_0001>
module attributes {stable_mosaic.version = 11 : i64} {
  func.func @_softmax_model_kernel(%arg0: i32, %arg1: memref<8x32xf32, #tpu.memory_space<vmem>>, %arg2: memref<32x128xf32, #tpu.memory_space<vmem>>, %arg3: memref<1x128xf32, #tpu.memory_space<vmem>>, %arg4: memref<8x128xf32, #tpu.memory_space<vmem>>) attributes {dimension_semantics = [#tpu.dimension_semantics<parallel>], iteration_bounds = array<i64: 1>, scalar_prefetch = 0 : i64, scratch_operands = 0 : i64, tpu.core_type = #tpu.core_type<tc>, window_params = [{transform_indices = @transform_0, window_bounds = array<i64: 8, 32>}, {pipeline_mode = #tpu.pipeline_mode<synchronous>, transform_indices = @transform_1, window_bounds = array<i64: 32, 128>}, {pipeline_mode = #tpu.pipeline_mode<synchronous>, transform_indices = @transform_2, window_bounds = array<i64: 1, 128>}, {transform_indices = @transform_3, window_bounds = array<i64: 8, 128>}]} {
    %c0 = arith.constant 0 : index
    %c0_0 = arith.constant 0 : index
    %0 = vector.load %arg1[%c0, %c0_0] : memref<8x32xf32, #tpu.memory_space<vmem>>, vector<8x32xf32>
    %c0_1 = arith.constant 0 : index
    %c0_2 = arith.constant 0 : index
    %1 = vector.load %arg2[%c0_1, %c0_2] : memref<32x128xf32, #tpu.memory_space<vmem>>, vector<32x128xf32>
    %cst = arith.constant dense<0.000000e+00> : vector<8x128xf32>
    %2 = tpu.matmul %0, %1, %cst {dimension_numbers = #tpu.dot_dimension_numbers<[1], [0], [0], [1], [0, 0, 1, 1], [], []>} : vector<8x32xf32>, vector<32x128xf32>, vector<8x128xf32> -> vector<8x128xf32>
    %c0_3 = arith.constant 0 : index
    %c0_4 = arith.constant 0 : index
    %3 = vector.load %arg3[%c0_3, %c0_4] : memref<1x128xf32, #tpu.memory_space<vmem>>, vector<1x128xf32>
    %4 = vector.broadcast %3 : vector<1x128xf32> to vector<8x128xf32>
    %5 = arith.addf %2, %4 : vector<8x128xf32>
    %cst_5 = arith.constant dense<0xFF800000> : vector<8xf32>
    %6 = vector.multi_reduction <maximumf>, %5, %cst_5 [1] : vector<8x128xf32> to vector<8xf32>
    %7 = vector.shape_cast %6 : vector<8xf32> to vector<8x1xf32>
    %8 = vector.broadcast %7 : vector<8x1xf32> to vector<8x128xf32>
    %9 = arith.subf %5, %8 : vector<8x128xf32>
    %10 = math.exp %9 : vector<8x128xf32>
    %cst_6 = arith.constant dense<0.000000e+00> : vector<8xf32>
    %11 = vector.multi_reduction <add>, %10, %cst_6 [1] : vector<8x128xf32> to vector<8xf32>
    %12 = vector.shape_cast %11 : vector<8xf32> to vector<8x1xf32>
    %13 = tpu.reciprocal %12 : vector<8x1xf32> -> vector<8x1xf32>
    %14 = vector.broadcast %13 : vector<8x1xf32> to vector<8x128xf32>
    %15 = arith.mulf %10, %14 : vector<8x128xf32>
    %c0_7 = arith.constant 0 : index
    %c0_8 = arith.constant 0 : index
    %16 = vector.load %arg4[%c0_7, %c0_8] : memref<8x128xf32, #tpu.memory_space<vmem>>, vector<8x128xf32>
    tpu.vector_store %arg4[%c0_7, %c0_8], %15 {strides = array<i32>} : memref<8x128xf32, #tpu.memory_space<vmem>>, vector<8x128xf32>,
    return
  }
  func.func @transform_0(%arg0: i32) -> (i32, i32) {
    %c0_i32 = arith.constant 0 : i32
    %c0_i32_0 = arith.constant 0 : i32
    return %arg0, %c0_i32 : i32, i32
  }
  func.func @transform_1(%arg0: i32) -> (i32, i32) {
    %c0_i32 = arith.constant 0 : i32
    %c0_i32_0 = arith.constant 0 : i32
    %c0_i32_1 = arith.constant 0 : i32
    return %c0_i32, %c0_i32_0 : i32, i32
  }
  func.func @transform_2(%arg0: i32) -> (i32, i32) {
    %c0_i32 = arith.constant 0 : i32
    %c0_i32_0 = arith.constant 0 : i32
    %c0_i32_1 = arith.constant 0 : i32
    return %c0_i32, %c0_i32_0 : i32, i32
  }
  func.func @transform_3(%arg0: i32) -> (i32, i32) {
    %c0_i32 = arith.constant 0 : i32
    %c0_i32_0 = arith.constant 0 : i32
    return %arg0, %c0_i32 : i32, i32
  }
}

</mosaic_0001>

<bundles_post_ra>
// kernel: tpu_custom_call.1
= control target key start
LH: loop header
LB: loop body
LE: loop exit
PB: predicated region body
PF: predicated region fallthrough
CT: control target
= control target key end

     0   :  { %8 = vsyncpa [#allocation3], 0  ;;  %s335_s0 = inlined_call_operand.hbm [shape: f32[8,32], index: 0, kind: input, shape index: {}]   ;;  %s336_s1 = inlined_call_operand.hbm [shape: f32[32,128], index: 1, kind: input, shape index: {}]   ;;  %s337_s2 = inlined_call_operand.vmem [shape: f32[1,128], index: 2, kind: input, shape index: {}]   ;;  %s338_s3 = inlined_call_operand.hbm [shape: f32[8,128], index: 3, kind: output, shape index: {}]  }
   0x1   :  { %9 = vsyncpa [#allocation6], 0 }
   0x2   :  { %10 = vsyncpa [#allocation4], 0  ;;  %s261_s12 = smov [#allocation2]   ;;  %s262_s14 = smov [#allocation5]  }
   0x3   :  { %s17_s13 = sshll.u32 %s261_s12, 4  ;;  %s26_s15 = sshll.u32 %s262_s14, 4  ;;  %s18_s13 = int_to_ptr.vmem [resolvable:$true] %s17_s13  ;;  %s289_s15 = int_to_ptr.vmem [resolvable:$true] %s26_s15 }
   0x4   :  { %s189_s18 = scalar_lea.hbm %s335_s0, 128 }
   0x5   :  { %p190_p0 = scmp.ne.s32.totalorder %s335_s0, %s189_s18  ;;  %p193_p1 = scmp.lt.u32.totalorder %s189_s18, %s335_s0 }
   0x7   :  { %p195_p2 = pnand %p193_p1, %p190_p0 }
   0x9   :  { %198 = shalt.err (!%p195_p2)
}
   0xa   :  { %s199_s23 = scalar_lea.vmem %s18_s13, 128  ;;  %p204_p4 = scmp.lt.s32.totalorder %s18_s13, %s18_s13 }
   0xb   :  { %p200_p3 = scmp.ne.s32.totalorder %s18_s13, %s199_s23  ;;  %p205_p5 = scmp.lt.s32.totalorder %s199_s23, %s199_s23 }
   0xd   :  { %p206_p6 = por %p205_p5, %p204_p4 }
   0xf   :  { %p207_p7 = pnand %p206_p6, %p200_p3 }
  0x11   :  { %210 = shalt.err (!%p207_p7)
}
  0x12   :  { %20 = dma.hbm_to_vmem [thread:$0]  %s335_s0, 128, %s18_s13, [#allocation3]  }
  0x13   :  { %s211_s28 = scalar_lea.hbm %s336_s1, 512 }
  0x14   :  { %p212_p8 = scmp.ne.s32.totalorder %s336_s1, %s211_s28  ;;  %p215_p9 = scmp.lt.u32.totalorder %s211_s28, %s336_s1 }
  0x16   :  { %p217_p10 = pnand %p215_p9, %p212_p8 }
  0x18   :  { %220 = shalt.err (!%p217_p10)
}
  0x19   :  { %s221_s6 = scalar_lea.vmem %s289_s15, 512  ;;  %p226_p12 = scmp.lt.s32.totalorder %s289_s15, %s289_s15 }
  0x1a   :  { %p222_p11 = scmp.ne.s32.totalorder %s289_s15, %s221_s6  ;;  %p227_p13 = scmp.lt.s32.totalorder %s221_s6, %s221_s6 }
  0x1c   :  { %p228_p0 = por %p227_p13, %p226_p12 }
  0x1e   :  { %p229_p1 = pnand %p228_p0, %p222_p11 }
  0x20   :  { %232 = shalt.err (!%p229_p1)
}
  0x21   :  { %s263_s0 = smov 128   ;;  %s264_s7 = smov 8  }
  0x22   :  { %32 = dma.hbm_to_vmem [thread:$0]  %s336_s1, 512, %s289_s15, [#allocation6], %s263_s0, %s263_s0, %s264_s7  }
  0x23   :  { %255 = dma.done.wait [#allocation3], 128  }
  0x24   :  { %256 = vsyncadd [#allocation3], 4294967168 }
  0x25   :  { %257 = dma.done.wait [#allocation6], 512  }
  0x26   :  { %258 = vsyncadd [#allocation6], 4294966784  ;;  %v265_v0 = vmov 0.0|0.0   ;;  %vm266_vm0 = vmmov 0   ;;  %v267_v1 = vmov 0.0   ;;  %v42_v2 = vld [vmem:[#allocation5] sm:$0xff] }
  0x27   :  { %171 = vmatprep.subr.bf16.mxu0 %v265_v0  ;;  %168 = vmatprep.mubr.msk.f32.mxu0 %vm266_vm0, %v267_v1  ;;  %v43_v3 = vld [vmem:[#allocation5 + $0x8] sm:$0xff]  ;;  %v44_v4 = vld [vmem:[#allocation5 + $0x10] sm:$0xff]  ;;  %v45_v6 = vld [vmem:[#allocation5 + $0x18] sm:$0xff]  ;;  %vm53_vm1 = vcmask 261120   ;;  %s268_s11 = smov [#allocation7]  }
  0x28   :  { %v172_v5 = vpack.c.bf16 %v43_v3, %v42_v2  ;;  %v175_v7 = vpack.c.bf16 %v45_v6, %v44_v4  ;;  %v41_v8 = vld [vmem:[#allocation2] sm:$0xff]  ;;  %s143_s12 = sshll.u32 %s268_s11, 4  ;;  %s144_s12 = int_to_ptr.vmem [resolvable:$true] %s143_s12 }
  0x29   :  { %v153_v9 = vld [vmem:[%s337_s2] ss:$0 sm:$0xff]  ;;  %s233_s13 = scalar_lea.vmem %s144_s12, 128  ;;  %p238_p3 = scmp.lt.s32.totalorder %s144_s12, %s144_s12 }
  0x2a   :  { %173 = vmatpush3.bf16.msra.mxu0 %v172_v5  ;;  %p234_p2 = scmp.ne.s32.totalorder %s144_s12, %s233_s13  ;;  %p239_p4 = scmp.lt.s32.totalorder %s233_s13, %s233_s13 }
  0x2b   :  { %174 = vmatprep.subr.bf16.mxu0 %v265_v0 }
  0x2c   :  { %p240_p5 = por %p239_p4, %p238_p3 }
  0x2e   :  { %176 = vmatpush3.bf16.msra.mxu0 %v175_v7  ;;  %p241_p6 = pnand %p240_p5, %p234_p2 }
  0x31   :  { %169 = vmatmul.mubr.msk.f32.vlgmr.msra.gmra.mrb[0].mxu0 %vm53_vm1, %v41_v8 }
 0x104   :  { %v123_v10 = vpop.f32.mrb[0].mxu0 }
 0x105   :  { %v124_v11 = vadd.f32 %v153_v9, %v123_v10  ;;  %v170_v12 = vpop.f32.mrb[1].mxu0 }
 0x107   :  { %127 = vmax.xlane.f32.xlu0 %v124_v11 }
 0x194   :  { %v128_v13 = vpop.xlane.xlu0 %127 }
 0x195   :  { %v129_v14 = vsub.f32 %v124_v11, %v128_v13 }
 0x197   :  { %v130_v15 = vmul.f32 1.442695, %v129_v14 }
 0x199   :  { %185 = vpow2.f32 %v130_v15 }
 0x1a3   :  { %v186_v16 = vpop.eup %185 }
 0x1a4   :  { %132 = vadd.xlane.f32.xlu0 %v186_v16 }
 0x231   :  { %v133_v17 = vpop.xlane.xlu0 %132 }
 0x232   :  { %187 = vrcp.f32 %v133_v17 }
 0x23c   :  { %v188_v18 = vpop.eup %187 }
 0x23d   :  { %v135_v19 = vmul.f32 %v188_v18, %v186_v16 }
 0x23f   :  { %136 = vst [vmem:[#allocation7] sm:$0xff] %v135_v19 }
 0x240   :  { %244 = shalt.err (!%p241_p6)
}
 0x241   :  { %s245_s15 = scalar_lea.hbm %s338_s3, 128 }
 0x242   :  { %p246_p7 = scmp.ne.s32.totalorder %s338_s3, %s245_s15  ;;  %p249_p8 = scmp.lt.u32.totalorder %s245_s15, %s338_s3 }
 0x244   :  { %p251_p9 = pnand %p249_p8, %p246_p7 }
 0x246   :  { %254 = shalt.err (!%p251_p9)
}
 0x247   :  { %146 = dma.vmem_to_hbm [thread:$0]  %s144_s12, 128, %s338_s3, [#allocation4]  }
 0x248   :  { %259 = dma.done.wait [#allocation4], 128  }
 0x249   :  { %260 = vsyncadd [#allocation4], 4294967168 }
 0x24a   :  { %150 = vsyncpa [#allocation3], 1 }
 0x24b   :  { %151 = vsyncpa [#allocation6], 1 }
 0x24c   :  { %152 = vsyncpa [#allocation4], 1 }

</bundles_post_ra>
